<compile_context>
chip_gen: v6e
topology: v6e:2x2x1
jax: 0.10.0
libtpu: 0.0.40
codegen_flags: <defaults>
</compile_context>

<pallas_src>
import functools

import jax
import jax.numpy as jnp
from jax.experimental import pallas as pl
from jax.experimental.pallas import tpu as pltpu

LANE = 128     # lane width  : last-dim alignment (dense vector stores, MXU N/K)
SUBLANE = 8    # sublane width: second-to-last-dim alignment


def _round_up(n: int, m: int) -> int:
    return ((n + m - 1) // m) * m


# ---------------------------------------------------------------------------
# Fused Pallas kernel: whole MDAE forward for one batch tile.
#   refs = (x, w0, b0, w1, b1, ..., w_{L-1}, b_{L-1}, latent_out, recon_out)
# ---------------------------------------------------------------------------
def _mdae_fused_kernel(*refs, activations, negative_slope, latent_index):
    n_layers = len(activations)
    assert len(refs) == 3 + 2 * n_layers
    x_ref = refs[0]
    latent_ref = refs[1 + 2 * n_layers]
    out_ref = refs[2 + 2 * n_layers]

    h = x_ref[...]                                    # (TB, pad_in) bf16
    for layer in range(n_layers):                     # fully unrolled chain
        w_ref = refs[1 + 2 * layer]                   # (pad_fi, pad_fo) bf16
        b_ref = refs[2 + 2 * layer]                   # (1, pad_fo)      f32
        y = jnp.dot(h.astype(w_ref.dtype), w_ref[...],
                    preferred_element_type=jnp.float32) + b_ref[...]
        act = activations[layer]
        if act == "leaky_relu":
            h = jnp.where(y >= 0.0, y, negative_slope * y)
        elif act == "sigmoid":
            # numerically-safe sigmoid; exp + approx reciprocal both hit the
            # EUP slot, keeping the VALU free.
            yc = jnp.clip(y, -30.0, 30.0)
            h = pl.reciprocal(1.0 + jnp.exp(-yc), approx=True)
        else:
            raise ValueError(f"unknown activation {act}")
        # TODO(synk): dropout uses inference semantics (identity); training-mode
        # stochastic dropout would need pltpu.prng_seed/prng_random_bits masking.
        if layer == latent_index:
            latent_ref[...] = h.astype(latent_ref.dtype)
    out_ref[...] = h.astype(out_ref.dtype)


# ---------------------------------------------------------------------------
# Parameter construction (mimics PyTorch nn.Linear default init) + packing.
# ---------------------------------------------------------------------------
def init_linear(key, fan_in, fan_out):
    # PyTorch nn.Linear default: U(-1/sqrt(fan_in), 1/sqrt(fan_in)) for W and b.
    kw, kb = jax.random.split(key)
    bound = 1.0 / jnp.sqrt(jnp.float32(fan_in))
    w = jax.random.uniform(kw, (fan_in, fan_out), jnp.float32, -bound, bound)
    b = jax.random.uniform(kb, (fan_out,), jnp.float32, -bound, bound)
    return w, b


def build_mdae_params(key, input_dimensions, num_layers, latent_dimensions):
    # NOTE: like the PyTorch reference, delta truncates if not evenly divisible;
    # layer shapes still chain correctly because lv / output_layer re-target
    # latent_dimensions / input_dimensions explicitly.
    delta = int((input_dimensions - latent_dimensions) / num_layers)
    params = {"encoder": [], "decoder": []}
    keys = iter(jax.random.split(key, 2 * (num_layers - 1) + 2))

    nunits = input_dimensions
    for _ in range(num_layers - 1):
        params["encoder"].append(init_linear(next(keys), nunits, nunits - delta))
        nunits = nunits - delta
    params["lv"] = init_linear(next(keys), nunits, latent_dimensions)

    nunits = latent_dimensions
    for _ in range(num_layers - 1):
        params["decoder"].append(init_linear(next(keys), nunits, nunits + delta))
        nunits = nunits + delta
    params["output_layer"] = init_linear(next(keys), nunits, input_dimensions)
    return params, delta


def pack_mdae_params(params, weight_dtype=jnp.bfloat16):
    """Flatten layers in forward order, zero-pad to lane-aligned shapes.

    Zero-padded weight rows kill any values in padded input lanes; zero-padded
    weight columns + zero bias make padded output lanes act(0), which the next
    layer's zero rows again ignore — so the padded math is exact for the real
    (unpadded) lanes.
    """
    layers, activations = [], []
    for w, b in params["encoder"]:
        layers.append((w, b)); activations.append("leaky_relu")
    layers.append(params["lv"]); activations.append("sigmoid")
    latent_index = len(layers) - 1
    for w, b in params["decoder"]:
        layers.append((w, b)); activations.append("leaky_relu")
    layers.append(params["output_layer"]); activations.append("sigmoid")

    packed = []
    for w, b in layers:
        fi, fo = w.shape
        pi, po = _round_up(fi, LANE), _round_up(fo, LANE)
        wp = jnp.zeros((pi, po), weight_dtype).at[:fi, :fo].set(
            w.astype(weight_dtype))
        bp = jnp.zeros((1, po), jnp.float32).at[:, :fo].set(
            b.astype(jnp.float32))
        packed.append((wp, bp))
    return packed, tuple(activations), latent_index


# ---------------------------------------------------------------------------
# Fused MDAE forward.
# ---------------------------------------------------------------------------
def mdae_forward(packed, activations, latent_index, x, *,
                 input_dimensions, latent_dimensions,
                 leaky_relu=0.0, dropout=0.0, block_batch=256):
    del dropout  # inference semantics (identity), see TODO in kernel
    batch, in_dim = x.shape
    assert in_dim == input_dimensions

    pad_in = _round_up(input_dimensions, LANE)
    pad_latent = _round_up(latent_dimensions, LANE)
    pad_out = _round_up(input_dimensions, LANE)

    # batch tile: multiple of 8, at most block_batch; pad batch to a multiple.
    tb = min(_round_up(block_batch, SUBLANE), _round_up(batch, SUBLANE))
    pad_batch = _round_up(batch, tb)
    grid = (pad_batch // tb,)

    # Input packed bf16: halves x HBM traffic and feeds the MXU directly.
    xp = jnp.zeros((pad_batch, pad_in), jnp.bfloat16)
    xp = xp.at[:batch, :in_dim].set(x.astype(jnp.bfloat16))

    # Specs: batch-tiled x / outputs, resident whole-array weights & biases.
    in_specs = [pl.BlockSpec((tb, pad_in), lambda i: (i, 0))]
    flat_args = [xp]
    weight_bytes = 0
    flops = 0
    for w, b in packed:
        in_specs.append(pl.BlockSpec(w.shape, lambda i: (0, 0)))
        in_specs.append(pl.BlockSpec(b.shape, lambda i: (0, 0)))
        flat_args += [w, b]
        weight_bytes += w.size * w.dtype.itemsize + b.size * b.dtype.itemsize
        flops += 2 * pad_batch * w.shape[0] * w.shape[1]

    out_specs = [pl.BlockSpec((tb, pad_latent), lambda i: (i, 0)),
                 pl.BlockSpec((tb, pad_out), lambda i: (i, 0))]
    out_shape = [jax.ShapeDtypeStruct((pad_batch, pad_latent), jnp.float32),
                 jax.ShapeDtypeStruct((pad_batch, pad_out), jnp.float32)]

    act_bytes = (xp.dtype.itemsize * pad_batch * pad_in
                 + 4 * pad_batch * (pad_latent + pad_out))
    cost = pl.CostEstimate(
        flops=int(flops),
        transcendentals=int(pad_batch * (pad_latent + pad_out)),
        bytes_accessed=int(weight_bytes + act_bytes),
    )

    # VMEM budget: resident weights + double-buffered batch tiles + headroom.
    max_pad = max(pad_in, pad_latent, pad_out)
    tile_bytes = 4 * tb * (pad_in + pad_latent + pad_out + 4 * max_pad)
    vmem_needed = 2 * weight_bytes + 2 * tile_bytes
    vmem_limit = int(min(max(2 * vmem_needed, 32 * 2**20), 100 * 2**20))

    kernel = functools.partial(
        _mdae_fused_kernel,
        activations=activations,
        negative_slope=float(leaky_relu),
        latent_index=latent_index,
    )

    latent_p, out_p = pl.pallas_call(
        kernel,
        out_shape=out_shape,
        grid=grid,
        in_specs=in_specs,
        out_specs=out_specs,
        compiler_params=pltpu.CompilerParams(
            dimension_semantics=("parallel",),   # megacore-shard batch tiles
            vmem_limit_bytes=vmem_limit,
        ),
        cost_estimate=cost,
    )(*flat_args)

    latent = latent_p[:batch, :latent_dimensions]
    output = out_p[:batch, :input_dimensions]
    return latent, output


# ---------------------------------------------------------------------------
# Pure-JAX reference (f32) for correctness checking.
# ---------------------------------------------------------------------------
def mdae_forward_ref(params, x, *, leaky_relu=0.0):
    def lin(h, wb):
        w, b = wb
        return h @ w + b

    h = x
    for wb in params["encoder"]:
        y = lin(h, wb)
        h = jnp.where(y >= 0.0, y, leaky_relu * y)
    latent = jax.nn.sigmoid(lin(h, params["lv"]))
    h = latent
    for wb in params["decoder"]:
        y = lin(h, wb)
        h = jnp.where(y >= 0.0, y, leaky_relu * y)
    output = jax.nn.sigmoid(lin(h, params["output_layer"]))
    return latent, output


# ---------------------------------------------------------------------------
if __name__ == "__main__":
    # Small, shape-consistent config: delta = (64 - 16) / 3 = 16
    input_dimensions = 64
    num_layers = 3
    latent_dimensions = 16
    leaky_relu = 0.01
    batch = 8

    key = jax.random.PRNGKey(0)
    k_params, k_x = jax.random.split(key)

    params, delta = build_mdae_params(
        k_params, input_dimensions, num_layers, latent_dimensions
    )
    packed, activations, latent_index = pack_mdae_params(params)
    x = jax.random.uniform(k_x, (batch, input_dimensions), jnp.float32)

    latent, out = mdae_forward(
        packed, activations, latent_index, x,
        input_dimensions=input_dimensions,
        latent_dimensions=latent_dimensions,
        leaky_relu=leaky_relu, dropout=0.0,
    )
    jax.block_until_ready((latent, out))

    assert latent.shape == (batch, latent_dimensions)
    assert out.shape == (batch, input_dimensions)
    assert bool(jnp.all(jnp.isfinite(latent))) and bool(jnp.all(jnp.isfinite(out)))

    # Compare against the pure-JAX f32 reference (bf16 MXU inputs + approx
    # reciprocal introduce only small error; sigmoid bounds outputs to [0, 1]).
    latent_ref, out_ref = mdae_forward_ref(params, x, leaky_relu=leaky_relu)
    assert bool(jnp.max(jnp.abs(latent - latent_ref)) < 3e-2)
    assert bool(jnp.max(jnp.abs(out - out_ref)) < 3e-2)

    print("KERNEL_OK")
</pallas_src>

<mosaic_0001>
module attributes {stable_mosaic.version = 11 : i64} {
  func.func @_mdae_fused_kernel(%arg0: i32, %arg1: memref<8x128xbf16, #tpu.memory_space<vmem>>, %arg2: memref<128x128xbf16, #tpu.memory_space<vmem>>, %arg3: memref<1x128xf32, #tpu.memory_space<vmem>>, %arg4: memref<128x128xbf16, #tpu.memory_space<vmem>>, %arg5: memref<1x128xf32, #tpu.memory_space<vmem>>, %arg6: memref<128x128xbf16, #tpu.memory_space<vmem>>, %arg7: memref<1x128xf32, #tpu.memory_space<vmem>>, %arg8: memref<128x128xbf16, #tpu.memory_space<vmem>>, %arg9: memref<1x128xf32, #tpu.memory_space<vmem>>, %arg10: memref<128x128xbf16, #tpu.memory_space<vmem>>, %arg11: memref<1x128xf32, #tpu.memory_space<vmem>>, %arg12: memref<128x128xbf16, #tpu.memory_space<vmem>>, %arg13: memref<1x128xf32, #tpu.memory_space<vmem>>, %arg14: memref<8x128xf32, #tpu.memory_space<vmem>>, %arg15: memref<8x128xf32, #tpu.memory_space<vmem>>) attributes {dimension_semantics = [#tpu.dimension_semantics<parallel>], iteration_bounds = array<i64: 1>, scalar_prefetch = 0 : i64, scratch_operands = 0 : i64, tpu.core_type = #tpu.core_type<tc>, window_params = [{transform_indices = @transform_0, window_bounds = array<i64: 8, 128>}, {pipeline_mode = #tpu.pipeline_mode<synchronous>, transform_indices = @transform_1, window_bounds = array<i64: 128, 128>}, {pipeline_mode = #tpu.pipeline_mode<synchronous>, transform_indices = @transform_2, window_bounds = array<i64: 1, 128>}, {pipeline_mode = #tpu.pipeline_mode<synchronous>, transform_indices = @transform_3, window_bounds = array<i64: 128, 128>}, {pipeline_mode = #tpu.pipeline_mode<synchronous>, transform_indices = @transform_4, window_bounds = array<i64: 1, 128>}, {pipeline_mode = #tpu.pipeline_mode<synchronous>, transform_indices = @transform_5, window_bounds = array<i64: 128, 128>}, {pipeline_mode = #tpu.pipeline_mode<synchronous>, transform_indices = @transform_6, window_bounds = array<i64: 1, 128>}, {pipeline_mode = #tpu.pipeline_mode<synchronous>, transform_indices = @transform_7, window_bounds = array<i64: 128, 128>}, {pipeline_mode = #tpu.pipeline_mode<synchronous>, transform_indices = @transform_8, window_bounds = array<i64: 1, 128>}, {pipeline_mode = #tpu.pipeline_mode<synchronous>, transform_indices = @transform_9, window_bounds = array<i64: 128, 128>}, {pipeline_mode = #tpu.pipeline_mode<synchronous>, transform_indices = @transform_10, window_bounds = array<i64: 1, 128>}, {pipeline_mode = #tpu.pipeline_mode<synchronous>, transform_indices = @transform_11, window_bounds = array<i64: 128, 128>}, {pipeline_mode = #tpu.pipeline_mode<synchronous>, transform_indices = @transform_12, window_bounds = array<i64: 1, 128>}, {transform_indices = @transform_13, window_bounds = array<i64: 8, 128>}, {transform_indices = @transform_14, window_bounds = array<i64: 8, 128>}]} {
    %c0 = arith.constant 0 : index
    %c0_0 = arith.constant 0 : index
    %0 = vector.load %arg1[%c0, %c0_0] : memref<8x128xbf16, #tpu.memory_space<vmem>>, vector<8x128xbf16>
    %c0_1 = arith.constant 0 : index
    %c0_2 = arith.constant 0 : index
    %1 = vector.load %arg2[%c0_1, %c0_2] : memref<128x128xbf16, #tpu.memory_space<vmem>>, vector<128x128xbf16>
    %cst = arith.constant dense<0.000000e+00> : vector<8x128xf32>
    %2 = tpu.matmul %0, %1, %cst {dimension_numbers = #tpu.dot_dimension_numbers<[1], [0], [0], [1], [0, 0, 1, 1], [], []>} : vector<8x128xbf16>, vector<128x128xbf16>, vector<8x128xf32> -> vector<8x128xf32>
    %c0_3 = arith.constant 0 : index
    %c0_4 = arith.constant 0 : index
    %3 = vector.load %arg3[%c0_3, %c0_4] : memref<1x128xf32, #tpu.memory_space<vmem>>, vector<1x128xf32>
    %4 = vector.broadcast %3 : vector<1x128xf32> to vector<8x128xf32>
    %5 = arith.addf %2, %4 : vector<8x128xf32>
    %cst_5 = arith.constant 0.000000e+00 : f32
    %6 = vector.broadcast %cst_5 : f32 to vector<8x128xf32>
    %7 = arith.cmpf oge, %5, %6 : vector<8x128xf32>
    %cst_6 = arith.constant 0.00999999977 : f32
    %8 = vector.broadcast %cst_6 : f32 to vector<8x128xf32>
    %9 = arith.mulf %8, %5 : vector<8x128xf32>
    %10 = arith.select %7, %5, %9 : vector<8x128xi1>, vector<8x128xf32>
    %11 = arith.truncf %10 : vector<8x128xf32> to vector<8x128xbf16>
    %c0_7 = arith.constant 0 : index
    %c0_8 = arith.constant 0 : index
    %12 = vector.load %arg4[%c0_7, %c0_8] : memref<128x128xbf16, #tpu.memory_space<vmem>>, vector<128x128xbf16>
    %cst_9 = arith.constant dense<0.000000e+00> : vector<8x128xf32>
    %13 = tpu.matmul %11, %12, %cst_9 {dimension_numbers = #tpu.dot_dimension_numbers<[1], [0], [0], [1], [0, 0, 1, 1], [], []>} : vector<8x128xbf16>, vector<128x128xbf16>, vector<8x128xf32> -> vector<8x128xf32>
    %c0_10 = arith.constant 0 : index
    %c0_11 = arith.constant 0 : index
    %14 = vector.load %arg5[%c0_10, %c0_11] : memref<1x128xf32, #tpu.memory_space<vmem>>, vector<1x128xf32>
    %15 = vector.broadcast %14 : vector<1x128xf32> to vector<8x128xf32>
    %16 = arith.addf %13, %15 : vector<8x128xf32>
    %cst_12 = arith.constant 0.000000e+00 : f32
    %17 = vector.broadcast %cst_12 : f32 to vector<8x128xf32>
    %18 = arith.cmpf oge, %16, %17 : vector<8x128xf32>
    %cst_13 = arith.constant 0.00999999977 : f32
    %19 = vector.broadcast %cst_13 : f32 to vector<8x128xf32>
    %20 = arith.mulf %19, %16 : vector<8x128xf32>
    %21 = arith.select %18, %16, %20 : vector<8x128xi1>, vector<8x128xf32>
    %22 = arith.truncf %21 : vector<8x128xf32> to vector<8x128xbf16>
    %c0_14 = arith.constant 0 : index
    %c0_15 = arith.constant 0 : index
    %23 = vector.load %arg6[%c0_14, %c0_15] : memref<128x128xbf16, #tpu.memory_space<vmem>>, vector<128x128xbf16>
    %cst_16 = arith.constant dense<0.000000e+00> : vector<8x128xf32>
    %24 = tpu.matmul %22, %23, %cst_16 {dimension_numbers = #tpu.dot_dimension_numbers<[1], [0], [0], [1], [0, 0, 1, 1], [], []>} : vector<8x128xbf16>, vector<128x128xbf16>, vector<8x128xf32> -> vector<8x128xf32>
    %c0_17 = arith.constant 0 : index
    %c0_18 = arith.constant 0 : index
    %25 = vector.load %arg7[%c0_17, %c0_18] : memref<1x128xf32, #tpu.memory_space<vmem>>, vector<1x128xf32>
    %26 = vector.broadcast %25 : vector<1x128xf32> to vector<8x128xf32>
    %27 = arith.addf %24, %26 : vector<8x128xf32>
    %cst_19 = arith.constant -3.000000e+01 : f32
    %cst_20 = arith.constant 3.000000e+01 : f32
    %28 = vector.broadcast %cst_19 : f32 to vector<8x128xf32>
    %29 = arith.maximumf %28, %27 : vector<8x128xf32>
    %30 = vector.broadcast %cst_20 : f32 to vector<8x128xf32>
    %31 = arith.minimumf %30, %29 : vector<8x128xf32>
    %cst_21 = arith.constant 0.000000e+00 : f32
    %32 = vector.broadcast %cst_21 : f32 to vector<8x128xf32>
    %33 = arith.subf %32, %31 : vector<8x128xf32>
    %34 = math.exp %33 : vector<8x128xf32>
    %cst_22 = arith.constant 1.000000e+00 : f32
    %35 = vector.broadcast %cst_22 : f32 to vector<8x128xf32>
    %36 = arith.addf %35, %34 : vector<8x128xf32>
    %37 = tpu.reciprocal %36 {approx = true} : vector<8x128xf32> -> vector<8x128xf32>
    %c0_23 = arith.constant 0 : index
    %c0_24 = arith.constant 0 : index
    %38 = vector.load %arg14[%c0_23, %c0_24] : memref<8x128xf32, #tpu.memory_space<vmem>>, vector<8x128xf32>
    tpu.vector_store %arg14[%c0_23, %c0_24], %37 {strides = array<i32>} : memref<8x128xf32, #tpu.memory_space<vmem>>, vector<8x128xf32>,
    %39 = arith.truncf %37 : vector<8x128xf32> to vector<8x128xbf16>
    %c0_25 = arith.constant 0 : index
    %c0_26 = arith.constant 0 : index
    %40 = vector.load %arg8[%c0_25, %c0_26] : memref<128x128xbf16, #tpu.memory_space<vmem>>, vector<128x128xbf16>
    %cst_27 = arith.constant dense<0.000000e+00> : vector<8x128xf32>
    %41 = tpu.matmul %39, %40, %cst_27 {dimension_numbers = #tpu.dot_dimension_numbers<[1], [0], [0], [1], [0, 0, 1, 1], [], []>} : vector<8x128xbf16>, vector<128x128xbf16>, vector<8x128xf32> -> vector<8x128xf32>
    %c0_28 = arith.constant 0 : index
    %c0_29 = arith.constant 0 : index
    %42 = vector.load %arg9[%c0_28, %c0_29] : memref<1x128xf32, #tpu.memory_space<vmem>>, vector<1x128xf32>
    %43 = vector.broadcast %42 : vector<1x128xf32> to vector<8x128xf32>
    %44 = arith.addf %41, %43 : vector<8x128xf32>
    %cst_30 = arith.constant 0.000000e+00 : f32
    %45 = vector.broadcast %cst_30 : f32 to vector<8x128xf32>
    %46 = arith.cmpf oge, %44, %45 : vector<8x128xf32>
    %cst_31 = arith.constant 0.00999999977 : f32
    %47 = vector.broadcast %cst_31 : f32 to vector<8x128xf32>
    %48 = arith.mulf %47, %44 : vector<8x128xf32>
    %49 = arith.select %46, %44, %48 : vector<8x128xi1>, vector<8x128xf32>
    %50 = arith.truncf %49 : vector<8x128xf32> to vector<8x128xbf16>
    %c0_32 = arith.constant 0 : index
    %c0_33 = arith.constant 0 : index
    %51 = vector.load %arg10[%c0_32, %c0_33] : memref<128x128xbf16, #tpu.memory_space<vmem>>, vector<128x128xbf16>
    %cst_34 = arith.constant dense<0.000000e+00> : vector<8x128xf32>
    %52 = tpu.matmul %50, %51, %cst_34 {dimension_numbers = #tpu.dot_dimension_numbers<[1], [0], [0], [1], [0, 0, 1, 1], [], []>} : vector<8x128xbf16>, vector<128x128xbf16>, vector<8x128xf32> -> vector<8x128xf32>
    %c0_35 = arith.constant 0 : index
    %c0_36 = arith.constant 0 : index
    %53 = vector.load %arg11[%c0_35, %c0_36] : memref<1x128xf32, #tpu.memory_space<vmem>>, vector<1x128xf32>
    %54 = vector.broadcast %53 : vector<1x128xf32> to vector<8x128xf32>
    %55 = arith.addf %52, %54 : vector<8x128xf32>
    %cst_37 = arith.constant 0.000000e+00 : f32
    %56 = vector.broadcast %cst_37 : f32 to vector<8x128xf32>
    %57 = arith.cmpf oge, %55, %56 : vector<8x128xf32>
    %cst_38 = arith.constant 0.00999999977 : f32
    %58 = vector.broadcast %cst_38 : f32 to vector<8x128xf32>
    %59 = arith.mulf %58, %55 : vector<8x128xf32>
    %60 = arith.select %57, %55, %59 : vector<8x128xi1>, vector<8x128xf32>
    %61 = arith.truncf %60 : vector<8x128xf32> to vector<8x128xbf16>
    %c0_39 = arith.constant 0 : index
    %c0_40 = arith.constant 0 : index
    %62 = vector.load %arg12[%c0_39, %c0_40] : memref<128x128xbf16, #tpu.memory_space<vmem>>, vector<128x128xbf16>
    %cst_41 = arith.constant dense<0.000000e+00> : vector<8x128xf32>
    %63 = tpu.matmul %61, %62, %cst_41 {dimension_numbers = #tpu.dot_dimension_numbers<[1], [0], [0], [1], [0, 0, 1, 1], [], []>} : vector<8x128xbf16>, vector<128x128xbf16>, vector<8x128xf32> -> vector<8x128xf32>
    %c0_42 = arith.constant 0 : index
    %c0_43 = arith.constant 0 : index
    %64 = vector.load %arg13[%c0_42, %c0_43] : memref<1x128xf32, #tpu.memory_space<vmem>>, vector<1x128xf32>
    %65 = vector.broadcast %64 : vector<1x128xf32> to vector<8x128xf32>
    %66 = arith.addf %63, %65 : vector<8x128xf32>
    %cst_44 = arith.constant -3.000000e+01 : f32
    %cst_45 = arith.constant 3.000000e+01 : f32
    %67 = vector.broadcast %cst_44 : f32 to vector<8x128xf32>
    %68 = arith.maximumf %67, %66 : vector<8x128xf32>
    %69 = vector.broadcast %cst_45 : f32 to vector<8x128xf32>
    %70 = arith.minimumf %69, %68 : vector<8x128xf32>
    %cst_46 = arith.constant 0.000000e+00 : f32
    %71 = vector.broadcast %cst_46 : f32 to vector<8x128xf32>
    %72 = arith.subf %71, %70 : vector<8x128xf32>
    %73 = math.exp %72 : vector<8x128xf32>
    %cst_47 = arith.constant 1.000000e+00 : f32
    %74 = vector.broadcast %cst_47 : f32 to vector<8x128xf32>
    %75 = arith.addf %74, %73 : vector<8x128xf32>
    %76 = tpu.reciprocal %75 {approx = true} : vector<8x128xf32> -> vector<8x128xf32>
    %c0_48 = arith.constant 0 : index
    %c0_49 = arith.constant 0 : index
    %77 = vector.load %arg15[%c0_48, %c0_49] : memref<8x128xf32, #tpu.memory_space<vmem>>, vector<8x128xf32>
    tpu.vector_store %arg15[%c0_48, %c0_49], %76 {strides = array<i32>} : memref<8x128xf32, #tpu.memory_space<vmem>>, vector<8x128xf32>,
    return
  }
  func.func @transform_0(%arg0: i32) -> (i32, i32) {
    %c0_i32 = arith.constant 0 : i32
    %c0_i32_0 = arith.constant 0 : i32
    return %arg0, %c0_i32 : i32, i32
  }
  func.func @transform_1(%arg0: i32) -> (i32, i32) {
    %c0_i32 = arith.constant 0 : i32
    %c0_i32_0 = arith.constant 0 : i32
    %c0_i32_1 = arith.constant 0 : i32
    return %c0_i32, %c0_i32_0 : i32, i32
  }
  func.func @transform_2(%arg0: i32) -> (i32, i32) {
    %c0_i32 = arith.constant 0 : i32
    %c0_i32_0 = arith.constant 0 : i32
    %c0_i32_1 = arith.constant 0 : i32
    return %c0_i32, %c0_i32_0 : i32, i32
  }
  func.func @transform_3(%arg0: i32) -> (i32, i32) {
    %c0_i32 = arith.constant 0 : i32
    %c0_i32_0 = arith.constant 0 : i32
    %c0_i32_1 = arith.constant 0 : i32
    return %c0_i32, %c0_i32_0 : i32, i32
  }
  func.func @transform_4(%arg0: i32) -> (i32, i32) {
    %c0_i32 = arith.constant 0 : i32
    %c0_i32_0 = arith.constant 0 : i32
    %c0_i32_1 = arith.constant 0 : i32
    return %c0_i32, %c0_i32_0 : i32, i32
  }
  func.func @transform_5(%arg0: i32) -> (i32, i32) {
    %c0_i32 = arith.constant 0 : i32
    %c0_i32_0 = arith.constant 0 : i32
    %c0_i32_1 = arith.constant 0 : i32
    return %c0_i32, %c0_i32_0 : i32, i32
  }
  func.func @transform_6(%arg0: i32) -> (i32, i32) {
    %c0_i32 = arith.constant 0 : i32
    %c0_i32_0 = arith.constant 0 : i32
    %c0_i32_1 = arith.constant 0 : i32
    return %c0_i32, %c0_i32_0 : i32, i32
  }
  func.func @transform_7(%arg0: i32) -> (i32, i32) {
    %c0_i32 = arith.constant 0 : i32
    %c0_i32_0 = arith.constant 0 : i32
    %c0_i32_1 = arith.constant 0 : i32
    return %c0_i32, %c0_i32_0 : i32, i32
  }
  func.func @transform_8(%arg0: i32) -> (i32, i32) {
    %c0_i32 = arith.constant 0 : i32
    %c0_i32_0 = arith.constant 0 : i32
    %c0_i32_1 = arith.constant 0 : i32
    return %c0_i32, %c0_i32_0 : i32, i32
  }
  func.func @transform_9(%arg0: i32) -> (i32, i32) {
    %c0_i32 = arith.constant 0 : i32
    %c0_i32_0 = arith.constant 0 : i32
    %c0_i32_1 = arith.constant 0 : i32
    return %c0_i32, %c0_i32_0 : i32, i32
  }
  func.func @transform_10(%arg0: i32) -> (i32, i32) {
    %c0_i32 = arith.constant 0 : i32
    %c0_i32_0 = arith.constant 0 : i32
    %c0_i32_1 = arith.constant 0 : i32
    return %c0_i32, %c0_i32_0 : i32, i32
  }
  func.func @transform_11(%arg0: i32) -> (i32, i32) {
    %c0_i32 = arith.constant 0 : i32
    %c0_i32_0 = arith.constant 0 : i32
    %c0_i32_1 = arith.constant 0 : i32
    return %c0_i32, %c0_i32_0 : i32, i32
  }
  func.func @transform_12(%arg0: i32) -> (i32, i32) {
    %c0_i32 = arith.constant 0 : i32
    %c0_i32_0 = arith.constant 0 : i32
    %c0_i32_1 = arith.constant 0 : i32
    return %c0_i32, %c0_i32_0 : i32, i32
  }
  func.func @transform_13(%arg0: i32) -> (i32, i32) {
    %c0_i32 = arith.constant 0 : i32
    %c0_i32_0 = arith.constant 0 : i32
    return %arg0, %c0_i32 : i32, i32
  }
  func.func @transform_14(%arg0: i32) -> (i32, i32) {
    %c0_i32 = arith.constant 0 : i32
    %c0_i32_0 = arith.constant 0 : i32
    return %arg0, %c0_i32 : i32, i32
  }
}

</mosaic_0001>

<bundles_post_ra>
// kernel: tpu_custom_call.1
= control target key start
LH: loop header
LB: loop body
LE: loop exit
PB: predicated region body
PF: predicated region fallthrough
CT: control target
= control target key end

     0   :  { %20 = vsyncpa [#allocation3], 0  ;;  %s1576_s0 = inlined_call_operand.hbm [shape: bf16[8,128], index: 0, kind: input, shape index: {}]   ;;  %s1577_s1 = inlined_call_operand.hbm [shape: bf16[128,128], index: 1, kind: input, shape index: {}]   ;;  %s1578_s2 = inlined_call_operand.vmem [shape: f32[1,128], index: 2, kind: input, shape index: {}]   ;;  %s1579_s3 = inlined_call_operand.hbm [shape: bf16[128,128], index: 3, kind: input, shape index: {}]   ;;  %s1580_s4 = inlined_call_operand.vmem [shape: f32[1,128], index: 4, kind: input, shape index: {}]   ;;  %s1581_s5 = inlined_call_operand.hbm [shape: bf16[128,128], index: 5, kind: input, shape index: {}]   ;;  %s1582_s6 = inlined_call_operand.vmem [shape: f32[1,128], index: 6, kind: input, shape index: {}]   ;;  %s1583_s7 = inlined_call_operand.hbm [shape: bf16[128,128], index: 7, kind: input, shape index: {}]   ;;  %s1584_s8 = inlined_call_operand.vmem [shape: f32[1,128], index: 8, kind: input, shape index: {}]   ;;  %s1585_s9 = inlined_call_operand.hbm [shape: bf16[128,128], index: 9, kind: input, shape index: {}]   ;;  %s1586_s10 = inlined_call_operand.vmem [shape: f32[1,128], index: 10, kind: input, shape index: {}]   ;;  %s1587_s11 = inlined_call_operand.hbm [shape: bf16[128,128], index: 11, kind: input, shape index: {}]   ;;  %s1588_s12 = inlined_call_operand.vmem [shape: f32[1,128], index: 12, kind: input, shape index: {}]   ;;  %s1589_s13 = inlined_call_operand.hbm [shape: f32[8,128], index: 13, kind: output, shape index: {0}]   ;;  %s1590_s14 = inlined_call_operand.hbm [shape: f32[8,128], index: 14, kind: output, shape index: {1}]  }
   0x1   :  { %21 = vsyncpa [#allocation6], 0 }
   0x2   :  { %22 = vsyncpa [#allocation9], 0 }
   0x3   :  { %23 = vsyncpa [#allocation12], 0 }
   0x4   :  { %24 = vsyncpa [#allocation4], 0 }
   0x5   :  { %25 = vsyncpa [#allocation16], 0  ;;  %s1365_s29 = smov [#allocation5]  }
   0x6   :  { %s41_s30 = sshll.u32 %s1365_s29, 4  ;;  %s42_s30 = int_to_ptr.vmem [resolvable:$true] %s41_s30 }
   0x7   :  { %s1181_s15 = scalar_lea.vmem %s42_s30, 1024  ;;  %p1186_p1 = scmp.lt.s32.totalorder %s42_s30, %s42_s30 }
   0x8   :  { %p1182_p0 = scmp.ne.s32.totalorder %s42_s30, %s1181_s15  ;;  %p1187_p2 = scmp.lt.s32.totalorder %s1181_s15, %s1181_s15 }
   0xa   :  { %p1188_p3 = por %p1187_p2, %p1186_p1 }
   0xc   :  { %p1189_p4 = pnand %p1188_p3, %p1182_p0 }
   0xe   :  { %1192 = shalt.err (!%p1189_p4)
}
   0xf   :  { %s1366_s16 = smov 64   ;;  %s1367_s17 = smov 4  }
  0x10   :  { %47 = dma.hbm_to_vmem [thread:$0]  %s1577_s1, 1024, %s42_s30, [#allocation6], %s1366_s16, %s1366_s16, %s1367_s17  }
  0x11   :  { %s1368_s20 = smov [#allocation8]   ;;  %s1369_s22 = smov [#allocation11]  }
  0x12   :  { %s69_s21 = sshll.u32 %s1368_s20, 4  ;;  %s97_s23 = sshll.u32 %s1369_s22, 4  ;;  %s70_s21 = int_to_ptr.vmem [resolvable:$true] %s69_s21  ;;  %s98_s23 = int_to_ptr.vmem [resolvable:$true] %s97_s23 }
  0x13   :  { %s1201_s24 = scalar_lea.vmem %s70_s21, 1024  ;;  %p1206_p6 = scmp.lt.s32.totalorder %s70_s21, %s70_s21 }
  0x14   :  { %p1202_p5 = scmp.ne.s32.totalorder %s70_s21, %s1201_s24  ;;  %p1207_p7 = scmp.lt.s32.totalorder %s1201_s24, %s1201_s24 }
  0x16   :  { %p1208_p8 = por %p1207_p7, %p1206_p6 }
  0x18   :  { %p1209_p9 = pnand %p1208_p8, %p1202_p5 }
  0x1a   :  { %1212 = shalt.err (!%p1209_p9)
}
  0x1b   :  { %75 = dma.hbm_to_vmem [thread:$0]  %s1581_s5, 1024, %s70_s21, [#allocation9], %s1366_s16, %s1366_s16, %s1367_s17  }
  0x1c   :  { %s1221_s1 = scalar_lea.vmem %s98_s23, 1024  ;;  %p1226_p11 = scmp.lt.s32.totalorder %s98_s23, %s98_s23 }
  0x1d   :  { %p1222_p10 = scmp.ne.s32.totalorder %s98_s23, %s1221_s1  ;;  %p1227_p12 = scmp.lt.s32.totalorder %s1221_s1, %s1221_s1 }
  0x1f   :  { %p1228_p13 = por %p1227_p12, %p1226_p11 }
  0x21   :  { %p1229_p0 = pnand %p1228_p13, %p1222_p10 }
  0x23   :  { %1232 = shalt.err (!%p1229_p0)
}
  0x24   :  { %103 = dma.hbm_to_vmem [thread:$0]  %s1585_s9, 1024, %s98_s23, [#allocation12], %s1366_s16, %s1366_s16, %s1367_s17  }
  0x25   :  { %s1370_s29 = smov [#allocation2]   ;;  %s1371_s15 = smov [#allocation7]  }
  0x26   :  { %s32_s30 = sshll.u32 %s1370_s29, 4  ;;  %s55_s5 = sshll.u32 %s1371_s15, 4  ;;  %s33_s30 = int_to_ptr.vmem [resolvable:$true] %s32_s30  ;;  %s56_s5 = int_to_ptr.vmem [resolvable:$true] %s55_s5 }
  0x27   :  { %s1241_s18 = scalar_lea.vmem %s33_s30, 64  ;;  %p1246_p2 = scmp.lt.s32.totalorder %s33_s30, %s33_s30 }
  0x28   :  { %p1242_p1 = scmp.ne.s32.totalorder %s33_s30, %s1241_s18  ;;  %p1247_p3 = scmp.lt.s32.totalorder %s1241_s18, %s1241_s18 }
  0x2a   :  { %p1248_p4 = por %p1247_p3, %p1246_p2 }
  0x2c   :  { %p1249_p5 = pnand %p1248_p4, %p1242_p1 }
  0x2e   :  { %1252 = shalt.err (!%p1249_p5)
}
  0x2f   :  { %35 = dma.hbm_to_vmem [thread:$0]  %s1576_s0, 64, %s33_s30, [#allocation3]  }
  0x30   :  { %s1261_s21 = scalar_lea.vmem %s56_s5, 1024  ;;  %p1266_p7 = scmp.lt.s32.totalorder %s56_s5, %s56_s5 }
  0x31   :  { %p1262_p6 = scmp.ne.s32.totalorder %s56_s5, %s1261_s21  ;;  %p1267_p8 = scmp.lt.s32.totalorder %s1261_s21, %s1261_s21 }
  0x33   :  { %p1268_p9 = por %p1267_p8, %p1266_p7 }
  0x35   :  { %p1269_p10 = pnand %p1268_p9, %p1262_p6 }
  0x37   :  { %1272 = shalt.err (!%p1269_p10)
}
  0x38   :  { %61 = dma.hbm_to_vmem [thread:$0]  %s1579_s3, 1024, %s56_s5, [#allocation6], %s1366_s16, %s1366_s16, %s1367_s17  }
  0x39   :  { %s1372_s23 = smov [#allocation10]   ;;  %s1373_s25 = smov [#allocation13]  }
  0x3a   :  { %s83_s24 = sshll.u32 %s1372_s23, 4  ;;  %s111_s0 = sshll.u32 %s1373_s25, 4  ;;  %s84_s24 = int_to_ptr.vmem [resolvable:$true] %s83_s24  ;;  %s112_s0 = int_to_ptr.vmem [resolvable:$true] %s111_s0 }
  0x3b   :  { %s1281_s26 = scalar_lea.vmem %s84_s24, 1024  ;;  %p1286_p12 = scmp.lt.s32.totalorder %s84_s24, %s84_s24 }
  0x3c   :  { %p1282_p11 = scmp.ne.s32.totalorder %s84_s24, %s1281_s26  ;;  %p1287_p13 = scmp.lt.s32.totalorder %s1281_s26, %s1281_s26 }
  0x3e   :  { %p1288_p0 = por %p1287_p13, %p1286_p12 }
  0x40   :  { %p1289_p1 = pnand %p1288_p0, %p1282_p11 }
  0x42   :  { %1292 = shalt.err (!%p1289_p1)
}
  0x43   :  { %89 = dma.hbm_to_vmem [thread:$0]  %s1583_s7, 1024, %s84_s24, [#allocation9], %s1366_s16, %s1366_s16, %s1367_s17  }
  0x44   :  { %s1301_s3 = scalar_lea.vmem %s112_s0, 1024  ;;  %p1306_p3 = scmp.lt.s32.totalorder %s112_s0, %s112_s0 }
  0x45   :  { %p1302_p2 = scmp.ne.s32.totalorder %s112_s0, %s1301_s3  ;;  %p1307_p4 = scmp.lt.s32.totalorder %s1301_s3, %s1301_s3 }
  0x47   :  { %p1308_p5 = por %p1307_p4, %p1306_p3 }
  0x49   :  { %p1309_p6 = pnand %p1308_p5, %p1302_p2 }
  0x4b   :  { %1312 = shalt.err (!%p1309_p6)
}
  0x4c   :  { %117 = dma.hbm_to_vmem [thread:$0]  %s1587_s11, 1024, %s112_s0, [#allocation12], %s1366_s16, %s1366_s16, %s1367_s17  }
  0x4d   :  { %1353 = dma.done.wait [#allocation3], 64  }
  0x4e   :  { %1354 = vsyncadd [#allocation3], 4294967232 }
  0x4f   :  { %1355 = dma.done.wait [#allocation6], 2048  }
  0x50   :  { %1356 = vsyncadd [#allocation6], 4294965248 }
  0x51   :  { %1357 = dma.done.wait [#allocation9], 2048  }
  0x52   :  { %1358 = vsyncadd [#allocation9], 4294965248 }
  0x53   :  { %1359 = dma.done.wait [#allocation12], 2048  }
  0x54   :  { %1360 = vsyncadd [#allocation12], 4294965248  ;;  %v1374_v0 = vmov 0.0   ;;  %vm1375_vm0 = vmmov 0   ;;  %v1117_v1 = vld [vmem:[#allocation5 + $0x38] sm:$0xff]   ;;  %v1118_v2 = vld [vmem:[#allocation5 + $0x30] sm:$0xff]  }
  0x55   :  { %984 = vmatprep.subr.bf16.mxu0 %v1374_v0  ;;  %1000 = vmatprep.mubr.msk.bf16.mxu0 %vm1375_vm0, %v1374_v0  ;;  %v1119_v3 = vld [vmem:[#allocation5 + $0x28] sm:$0xff]   ;;  %v1125_v4 = vld [vmem:[#allocation7 + $0x38] sm:$0xff]   ;;  %v1120_v5 = vld [vmem:[#allocation5 + $0x20] sm:$0xff]  }
  0x56   :  { %1004 = vmatprep.subr.bf16.mxu1 %v1374_v0  ;;  %1020 = vmatprep.mubr.msk.bf16.mxu1 %vm1375_vm0, %v1374_v0  ;;  %v1126_v6 = vld [vmem:[#allocation7 + $0x30] sm:$0xff]   ;;  %v1121_v7 = vld [vmem:[#allocation5 + $0x18] sm:$0xff]   ;;  %v1127_v8 = vld [vmem:[#allocation7 + $0x28] sm:$0xff]  }
  0x57   :  { %985 = vmatpush3.bf16.msra.mxu0 %v1117_v1  ;;  %1005 = vmatpush3.bf16.msra.mxu1 %v1125_v4  ;;  %v1122_v9 = vld [vmem:[#allocation5 + $0x10] sm:$0xff]   ;;  %v1128_v10 = vld [vmem:[#allocation7 + $0x20] sm:$0xff]   ;;  %v1123_v11 = vld [vmem:[#allocation5 + $0x8] sm:$0xff]  }
  0x58   :  { %986 = vmatprep.subr.bf16.mxu0 %v1374_v0  ;;  %1006 = vmatprep.subr.bf16.mxu1 %v1374_v0  ;;  %v1129_v12 = vld [vmem:[#allocation7 + $0x18] sm:$0xff]   ;;  %v1124_v13 = vld [vmem:[#allocation5] sm:$0xff]   ;;  %v1130_v14 = vld [vmem:[#allocation7 + $0x10] sm:$0xff]  }
  0x59   :  { %v142_v15 = vld [vmem:[#allocation2] sm:$0xf]  ;;  %v1131_v16 = vld [vmem:[#allocation7 + $0x8] sm:$0xff]   ;;  %v1132_v17 = vld [vmem:[#allocation7] sm:$0xff]  }
  0x5a   :  { %v1133_v18 = vld [vmem:[#allocation8 + $0x38] sm:$0xff]   ;;  %v1134_v19 = vld [vmem:[#allocation8 + $0x30] sm:$0xff]   ;;  %v1135_v20 = vld [vmem:[#allocation8 + $0x28] sm:$0xff]  }
  0x5b   :  { %987 = vmatpush3.bf16.msra.mxu0 %v1118_v2  ;;  %1007 = vmatpush3.bf16.msra.mxu1 %v1126_v6  ;;  %v1136_v21 = vld [vmem:[#allocation8 + $0x20] sm:$0xff]   ;;  %v1137_v22 = vld [vmem:[#allocation8 + $0x18] sm:$0xff]   ;;  %v1138_v23 = vld [vmem:[#allocation8 + $0x10] sm:$0xff]  }
  0x5c   :  { %988 = vmatprep.subr.bf16.mxu0 %v1374_v0  ;;  %1008 = vmatprep.subr.bf16.mxu1 %v1374_v0  ;;  %v874_v24 = vld [vmem:[%s1578_s2] ss:$0 sm:$0xff]  ;;  %v1139_v33 = vld [vmem:[#allocation8 + $0x8] sm:$0xff]   ;;  %v1140_v34 = vld [vmem:[#allocation8] sm:$0xff]  }
  0x5d   :  { %v883_v35 = vld [vmem:[%s1580_s4] ss:$0 sm:$0xff]  ;;  %v1142_v45 = vld [vmem:[#allocation10 + $0x30] sm:$0xff]   ;;  %v1143_v46 = vld [vmem:[#allocation10 + $0x28] sm:$0xff]  }
  0x5e   :  { %v1141_v44 = vld [vmem:[#allocation10 + $0x38] sm:$0xff]   ;;  %v1144_v47 = vld [vmem:[#allocation10 + $0x20] sm:$0xff]   ;;  %v1146_v49 = vld [vmem:[#allocation10 + $0x10] sm:$0xff]  }
  0x5f   :  { %989 = vmatpush3.bf16.msra.mxu0 %v1119_v3  ;;  %1009 = vmatpush3.bf16.msra.mxu1 %v1127_v8  ;;  %v1145_v48 = vld [vmem:[#allocation10 + $0x18] sm:$0xff]   ;;  %v1147_v50 = vld [vmem:[#allocation10 + $0x8] sm:$0xff]   ;;  %v1148_v51 = vld [vmem:[#allocation10] sm:$0xff]  }
  0x60   :  { %990 = vmatprep.subr.bf16.mxu0 %v1374_v0  ;;  %1010 = vmatprep.subr.bf16.mxu1 %v1374_v0  ;;  %v1149_v52 = vld [vmem:[#allocation11 + $0x38] sm:$0xff]   ;;  %v1150_v53 = vld [vmem:[#allocation11 + $0x30] sm:$0xff]   ;;  %v1151_v54 = vld [vmem:[#allocation11 + $0x28] sm:$0xff]  }
  0x61   :  { %v1152_v55 = vld [vmem:[#allocation11 + $0x20] sm:$0xff]   ;;  %v1153_v56 = vld [vmem:[#allocation11 + $0x18] sm:$0xff]   ;;  %v1154_v57 = vld [vmem:[#allocation11 + $0x10] sm:$0xff]  }
  0x62   :  { %v892_v58 = vld [vmem:[%s1582_s6] ss:$0 sm:$0xff]  ;;  %v1155_v8 = vld [vmem:[#allocation11 + $0x8] sm:$0xff]  }
  0x63   :  { %991 = vmatpush3.bf16.msra.mxu0 %v1120_v5  ;;  %1011 = vmatpush3.bf16.msra.mxu1 %v1128_v10  ;;  %v1157_v10 = vld [vmem:[#allocation13 + $0x38] sm:$0xff]  }
  0x64   :  { %992 = vmatprep.subr.bf16.mxu0 %v1374_v0  ;;  %1012 = vmatprep.subr.bf16.mxu1 %v1374_v0 }
  0x67   :  { %993 = vmatpush3.bf16.msra.mxu0 %v1121_v7  ;;  %1013 = vmatpush3.bf16.msra.mxu1 %v1129_v12  ;;  %v1159_v12 = vld [vmem:[#allocation13 + $0x28] sm:$0xff]  }
  0x68   :  { %994 = vmatprep.subr.bf16.mxu0 %v1374_v0  ;;  %1014 = vmatprep.subr.bf16.mxu1 %v1374_v0 }
  0x6b   :  { %995 = vmatpush3.bf16.msra.mxu0 %v1122_v9  ;;  %1015 = vmatpush3.bf16.msra.mxu1 %v1130_v14  ;;  %v1156_v9 = vld [vmem:[#allocation11] sm:$0xff]   ;;  %v1161_v14 = vld [vmem:[#allocation13 + $0x18] sm:$0xff]  }
  0x6c   :  { %996 = vmatprep.subr.bf16.mxu0 %v1374_v0  ;;  %1016 = vmatprep.subr.bf16.mxu1 %v1374_v0 }
  0x6f   :  { %997 = vmatpush3.bf16.msra.mxu0 %v1123_v11  ;;  %1017 = vmatpush3.bf16.msra.mxu1 %v1131_v16  ;;  %v1158_v11 = vld [vmem:[#allocation13 + $0x30] sm:$0xff]   ;;  %v902_v16 = vld [vmem:[%s1584_s8] ss:$0 sm:$0xff]  ;;  %s1376_s8 = smov [#allocation14]  }
  0x70   :  { %998 = vmatprep.subr.bf16.mxu0 %v1374_v0  ;;  %1018 = vmatprep.subr.bf16.mxu1 %v1374_v0  ;;  %s848_s18 = sshll.u32 %s1376_s8, 4  ;;  %s849_s18 = int_to_ptr.vmem [resolvable:$true] %s848_s18 }
  0x71   :  { %s1313_s19 = scalar_lea.vmem %s849_s18, 128  ;;  %p1318_p8 = scmp.lt.s32.totalorder %s849_s18, %s849_s18 }
  0x72   :  { %p1314_p7 = scmp.ne.s32.totalorder %s849_s18, %s1313_s19  ;;  %p1319_p9 = scmp.lt.s32.totalorder %s1313_s19, %s1313_s19 }
  0x73   :  { %999 = vmatpush3.bf16.msra.mxu0 %v1124_v13  ;;  %1019 = vmatpush3.bf16.msra.mxu1 %v1132_v17  ;;  %v1160_v13 = vld [vmem:[#allocation13 + $0x20] sm:$0xff]  }
  0x74   :  { %1024 = vmatprep.subr.bf16.mxu0 %v1374_v0  ;;  %1044 = vmatprep.subr.bf16.mxu1 %v1374_v0  ;;  %p1320_p10 = por %p1319_p9, %p1318_p8 }
  0x76   :  { %1001 = vmatmul.mubr.bf16.vlgmr.msra.gmra.mxu0 %v142_v15  ;;  %v1162_v15 = vld [vmem:[#allocation13 + $0x10] sm:$0xff]   ;;  %p1321_p11 = pnand %p1320_p10, %p1314_p7 }
  0x77   :  { %1040 = vmatprep.mubr.msk.bf16.mxu0 %vm1375_vm0, %v1374_v0  ;;  %1025 = vmatpush3.bf16.msra.mxu0 %v1133_v18 }
  0x78   :  { %1026 = vmatprep.subr.bf16.mxu0 %v1374_v0 }
  0x7b   :  { %1027 = vmatpush3.bf16.msra.mxu0 %v1134_v19 }
  0x7c   :  { %1028 = vmatprep.subr.bf16.mxu0 %v1374_v0 }
  0x7f   :  { %1029 = vmatpush3.bf16.msra.mxu0 %v1135_v20 }
  0x80   :  { %1030 = vmatprep.subr.bf16.mxu0 %v1374_v0 }
  0x83   :  { %1031 = vmatpush3.bf16.msra.mxu0 %v1136_v21 }
  0x84   :  { %1032 = vmatprep.subr.bf16.mxu0 %v1374_v0 }
  0x87   :  { %1033 = vmatpush3.bf16.msra.mxu0 %v1137_v22 }
  0x88   :  { %1034 = vmatprep.subr.bf16.mxu0 %v1374_v0 }
  0x8b   :  { %1035 = vmatpush3.bf16.msra.mxu0 %v1138_v23 }
  0x8c   :  { %1036 = vmatprep.subr.bf16.mxu0 %v1374_v0 }
  0x8f   :  { %1037 = vmatpush3.bf16.msra.mxu0 %v1139_v33 }
  0x90   :  { %1038 = vmatprep.subr.bf16.mxu0 %v1374_v0 }
  0x93   :  { %1039 = vmatpush3.bf16.msra.mxu0 %v1140_v34 }
  0x94   :  { %1064 = vmatprep.subr.bf16.mxu0 %v1374_v0 }
 0x136   :  { %v248_v25 = vpop.f32.mrf.mxu0 }
 0x137   :  { %v249_v26 = vadd.f32 %v874_v24, %v248_v25  ;;  %v1163_v25 = vld [vmem:[#allocation13 + $0x8] sm:$0xff]  }
 0x138   :  { %v1002_v27 = vpop.f32.mrf.mxu0 }
 0x139   :  { %vm254_vm1 = vcmp.ge.f32.partialorder %v249_v26, 0.0  ;;  %v255_v28 = vmul.f32 0.01, %v249_v26  ;;  %v911_v27 = vld [vmem:[%s1586_s10] ss:$0 sm:$0xff] }
 0x13a   :  { %v251_v29 = vpop.f32.mrf.mxu0 }
 0x13b   :  { %v256_v30 = vsel %vm254_vm1, %v249_v26, %v255_v28  ;;  %v1164_v26 = vld [vmem:[#allocation13] sm:$0xff]  }
 0x13c   :  { %v1003_v31 = vpop.f32.mrf.mxu0  ;;  %v257_v32 = vpack.c.bf16 %v256_v30, %v256_v30 }
 0x13e   :  { %1021 = vmatmul.mubr.bf16.vlgmr.msra.gmra.mxu1 %v257_v32 }
 0x13f   :  { %1060 = vmatprep.mubr.msk.bf16.mxu1 %vm1375_vm0, %v1374_v0  ;;  %1045 = vmatpush3.bf16.msra.mxu1 %v1141_v44 }
 0x140   :  { %1046 = vmatprep.subr.bf16.mxu1 %v1374_v0 }
 0x143   :  { %1047 = vmatpush3.bf16.msra.mxu1 %v1142_v45 }
 0x144   :  { %1048 = vmatprep.subr.bf16.mxu1 %v1374_v0 }
 0x147   :  { %1049 = vmatpush3.bf16.msra.mxu1 %v1143_v46 }
 0x148   :  { %1050 = vmatprep.subr.bf16.mxu1 %v1374_v0 }
 0x14b   :  { %1051 = vmatpush3.bf16.msra.mxu1 %v1144_v47 }
 0x14c   :  { %1052 = vmatprep.subr.bf16.mxu1 %v1374_v0 }
 0x14f   :  { %1053 = vmatpush3.bf16.msra.mxu1 %v1145_v48 }
 0x150   :  { %1054 = vmatprep.subr.bf16.mxu1 %v1374_v0 }
 0x153   :  { %1055 = vmatpush3.bf16.msra.mxu1 %v1146_v49 }
 0x154   :  { %1056 = vmatprep.subr.bf16.mxu1 %v1374_v0 }
 0x157   :  { %1057 = vmatpush3.bf16.msra.mxu1 %v1147_v50 }
 0x158   :  { %1058 = vmatprep.subr.bf16.mxu1 %v1374_v0 }
 0x15b   :  { %1059 = vmatpush3.bf16.msra.mxu1 %v1148_v51 }
 0x15c   :  { %1084 = vmatprep.subr.bf16.mxu1 %v1374_v0 }
 0x1fe   :  { %v363_v36 = vpop.f32.mrf.mxu1 }
 0x1ff   :  { %v364_v37 = vadd.f32 %v883_v35, %v363_v36 }
 0x200   :  { %v1022_v38 = vpop.f32.mrf.mxu1 }
 0x201   :  { %vm369_vm2 = vcmp.ge.f32.partialorder %v364_v37, 0.0  ;;  %v370_v39 = vmul.f32 0.01, %v364_v37 }
 0x202   :  { %v366_v40 = vpop.f32.mrf.mxu1 }
 0x203   :  { %v371_v41 = vsel %vm369_vm2, %v364_v37, %v370_v39 }
 0x204   :  { %v372_v42 = vpack.c.bf16 %v371_v41, %v371_v41  ;;  %v1023_v43 = vpop.f32.mrf.mxu1 }
 0x206   :  { %1041 = vmatmul.mubr.bf16.vlgmr.msra.gmra.mxu0 %v372_v42 }
 0x207   :  { %1080 = vmatprep.mubr.msk.bf16.mxu0 %vm1375_vm0, %v1374_v0  ;;  %1065 = vmatpush3.bf16.msra.mxu0 %v1149_v52 }
 0x208   :  { %1066 = vmatprep.subr.bf16.mxu0 %v1374_v0 }
 0x20b   :  { %1067 = vmatpush3.bf16.msra.mxu0 %v1150_v53 }
 0x20c   :  { %1068 = vmatprep.subr.bf16.mxu0 %v1374_v0 }
 0x20f   :  { %1069 = vmatpush3.bf16.msra.mxu0 %v1151_v54 }
 0x210   :  { %1070 = vmatprep.subr.bf16.mxu0 %v1374_v0 }
 0x213   :  { %1071 = vmatpush3.bf16.msra.mxu0 %v1152_v55 }
 0x214   :  { %1072 = vmatprep.subr.bf16.mxu0 %v1374_v0 }
 0x217   :  { %1073 = vmatpush3.bf16.msra.mxu0 %v1153_v56 }
 0x218   :  { %1074 = vmatprep.subr.bf16.mxu0 %v1374_v0 }
 0x21b   :  { %1075 = vmatpush3.bf16.msra.mxu0 %v1154_v57 }
 0x21c   :  { %1076 = vmatprep.subr.bf16.mxu0 %v1374_v0 }
 0x21f   :  { %1077 = vmatpush3.bf16.msra.mxu0 %v1155_v8 }
 0x220   :  { %1078 = vmatprep.subr.bf16.mxu0 %v1374_v0 }
 0x223   :  { %1079 = vmatpush3.bf16.msra.mxu0 %v1156_v9 }
 0x2c6   :  { %v478_v59 = vpop.f32.mrf.mxu0 }
 0x2c7   :  { %v479_v60 = vadd.f32 %v892_v58, %v478_v59 }
 0x2c8   :  { %v1042_v61 = vpop.f32.mrf.mxu0 }
 0x2c9   :  { %v901_v62 = vclamps-f32 %v479_v60, 30.0 }
 0x2ca   :  { %v481_v63 = vpop.f32.mrf.mxu0 }
 0x2cb   :  { %v486_v1 = vsub.f32 0.0, %v901_v62 }
 0x2cc   :  { %v1043_v2 = vpop.f32.mrf.mxu0 }
 0x2cd   :  { %v487_v3 = vmul.f32 1.442695, %v486_v1 }
 0x2cf   :  { %1165 = vpow2.f32 %v487_v3 }
 0x2dc   :  { %v1166_v4 = vpop.eup %1165 }
 0x2dd   :  { %v489_v5 = vadd.f32 1.0, %v1166_v4 }
 0x2df   :  { %1167 = vrcp.f32 %v489_v5 }
 0x2ec   :  { %v1168_v6 = vpop.eup %1167 }
 0x2ed   :  { %491 = vst [vmem:[#allocation14] sm:$0xff] %v1168_v6  ;;  %v492_v7 = vpack.c.bf16 %v1168_v6, %v1168_v6 }
 0x2ef   :  { %1061 = vmatmul.mubr.bf16.vlgmr.msra.gmra.mxu1 %v492_v7 }
 0x2f0   :  { %1100 = vmatprep.mubr.msk.bf16.mxu1 %vm1375_vm0, %v1374_v0  ;;  %1085 = vmatpush3.bf16.msra.mxu1 %v1157_v10 }
 0x2f1   :  { %1086 = vmatprep.subr.bf16.mxu1 %v1374_v0 }
 0x2f4   :  { %1087 = vmatpush3.bf16.msra.mxu1 %v1158_v11 }
 0x2f5   :  { %1088 = vmatprep.subr.bf16.mxu1 %v1374_v0 }
 0x2f8   :  { %1089 = vmatpush3.bf16.msra.mxu1 %v1159_v12 }
 0x2f9   :  { %1090 = vmatprep.subr.bf16.mxu1 %v1374_v0 }
 0x2fc   :  { %1091 = vmatpush3.bf16.msra.mxu1 %v1160_v13 }
 0x2fd   :  { %1092 = vmatprep.subr.bf16.mxu1 %v1374_v0 }
 0x300   :  { %1093 = vmatpush3.bf16.msra.mxu1 %v1161_v14 }
 0x301   :  { %1094 = vmatprep.subr.bf16.mxu1 %v1374_v0 }
 0x304   :  { %1095 = vmatpush3.bf16.msra.mxu1 %v1162_v15 }
 0x305   :  { %1096 = vmatprep.subr.bf16.mxu1 %v1374_v0 }
 0x308   :  { %1097 = vmatpush3.bf16.msra.mxu1 %v1163_v25 }
 0x309   :  { %1098 = vmatprep.subr.bf16.mxu1 %v1374_v0 }
 0x30c   :  { %1099 = vmatpush3.bf16.msra.mxu1 %v1164_v26 }
 0x3af   :  { %v598_v17 = vpop.f32.mrf.mxu1 }
 0x3b0   :  { %v599_v18 = vadd.f32 %v902_v16, %v598_v17 }
 0x3b1   :  { %v1062_v19 = vpop.f32.mrf.mxu1 }
 0x3b2   :  { %vm604_vm3 = vcmp.ge.f32.partialorder %v599_v18, 0.0  ;;  %v605_v20 = vmul.f32 0.01, %v599_v18 }
 0x3b3   :  { %v601_v21 = vpop.f32.mrf.mxu1 }
 0x3b4   :  { %v606_v22 = vsel %vm604_vm3, %v599_v18, %v605_v20 }
 0x3b5   :  { %v607_v23 = vpack.c.bf16 %v606_v22, %v606_v22  ;;  %v1063_v24 = vpop.f32.mrf.mxu1 }
 0x3b7   :  { %1081 = vmatmul.mubr.bf16.vlgmr.msra.gmra.mxu0 %v607_v23 }
 0x477   :  { %v713_v28 = vpop.f32.mrf.mxu0 }
 0x478   :  { %v714_v29 = vadd.f32 %v911_v27, %v713_v28 }
 0x479   :  { %v1082_v30 = vpop.f32.mrf.mxu0 }
 0x47a   :  { %vm719_vm4 = vcmp.ge.f32.partialorder %v714_v29, 0.0  ;;  %v720_v31 = vmul.f32 0.01, %v714_v29 }
 0x47b   :  { %v716_v32 = vpop.f32.mrf.mxu0 }
 0x47c   :  { %v721_v33 = vsel %vm719_vm4, %v714_v29, %v720_v31 }
 0x47d   :  { %v722_v34 = vpack.c.bf16 %v721_v33, %v721_v33  ;;  %v1083_v35 = vpop.f32.mrf.mxu0 }
 0x47f   :  { %1101 = vmatmul.mubr.bf16.vlgmr.msra.gmra.mxu1 %v722_v34 }
 0x480   :  { %1324 = shalt.err (!%p1321_p11)
}
 0x481   :  { %851 = dma.vmem_to_hbm [thread:$0]  %s849_s18, 128, %s1589_s13, [#allocation4]   ;;  %v920_v0 = vld [vmem:[%s1588_s12] ss:$0 sm:$0xff] }
 0x482   :  { %s1377_s22 = smov [#allocation15]  }
 0x483   :  { %s858_s23 = sshll.u32 %s1377_s22, 4  ;;  %s859_s23 = int_to_ptr.vmem [resolvable:$true] %s858_s23 }
 0x484   :  { %s1333_s13 = scalar_lea.vmem %s859_s23, 128  ;;  %p1338_p13 = scmp.lt.s32.totalorder %s859_s23, %s859_s23 }
 0x485   :  { %p1334_p12 = scmp.ne.s32.totalorder %s859_s23, %s1333_s13  ;;  %p1339_p0 = scmp.lt.s32.totalorder %s1333_s13, %s1333_s13 }
 0x487   :  { %p1340_p1 = por %p1339_p0, %p1338_p13 }
 0x489   :  { %p1341_p2 = pnand %p1340_p1, %p1334_p12 }
 0x53f   :  { %v828_v36 = vpop.f32.mrf.mxu1 }
 0x540   :  { %v829_v37 = vadd.f32 %v920_v0, %v828_v36 }
 0x541   :  { %v1102_v38 = vpop.f32.mrf.mxu1 }
 0x542   :  { %v929_v39 = vclamps-f32 %v829_v37, 30.0 }
 0x543   :  { %v831_v40 = vpop.f32.mrf.mxu1 }
 0x544   :  { %v836_v41 = vsub.f32 0.0, %v929_v39 }
 0x545   :  { %v1103_v42 = vpop.f32.mrf.mxu1 }
 0x546   :  { %v837_v43 = vmul.f32 1.442695, %v836_v41 }
 0x548   :  { %1169 = vpow2.f32 %v837_v43 }
 0x555   :  { %v1170_v44 = vpop.eup %1169 }
 0x556   :  { %v839_v45 = vadd.f32 1.0, %v1170_v44 }
 0x558   :  { %1171 = vrcp.f32 %v839_v45 }
 0x565   :  { %v1172_v46 = vpop.eup %1171 }
 0x566   :  { %841 = vst [vmem:[#allocation15] sm:$0xff] %v1172_v46 }
 0x567   :  { %1344 = shalt.err (!%p1341_p2)
}
 0x568   :  { %861 = dma.vmem_to_hbm [thread:$0]  %s859_s23, 128, %s1590_s14, [#allocation16]  }
 0x569   :  { %1361 = dma.done.wait [#allocation4], 128  }
 0x56a   :  { %1362 = vsyncadd [#allocation4], 4294967168 }
 0x56b   :  { %1363 = dma.done.wait [#allocation16], 128  }
 0x56c   :  { %1364 = vsyncadd [#allocation16], 4294967168 }
 0x56d   :  { %868 = vsyncpa [#allocation3], 1 }
 0x56e   :  { %869 = vsyncpa [#allocation6], 1 }
 0x56f   :  { %870 = vsyncpa [#allocation9], 1 }
 0x570   :  { %871 = vsyncpa [#allocation12], 1 }
 0x571   :  { %872 = vsyncpa [#allocation4], 1 }
 0x572   :  { %873 = vsyncpa [#allocation16], 1 }

</bundles_post_ra>
